<compile_context>
chip_gen: v7x
topology: tpu7x:2x2x1
jax: 0.10.0
libtpu: 0.0.40
codegen_flags: <defaults>
</compile_context>

<pallas_src>
import functools

import jax
import jax.numpy as jnp
import numpy as np
from jax.experimental import pallas as pl
from jax.experimental.pallas import tpu as pltpu


def _round_up(x, m):
    return ((x + m - 1) // m) * m


def _er_kernel(x_ref, w_ref, b_ref, lab_ref, pos_ref, part_ref,
               *, n_rows, block_rows):
    """One row-tile: logits = bf16(x) @ W + b ; POS tile + packed CE partials."""
    # --- linear layer (MXU, bf16 operands / f32 accumulate).  The bf16 cast
    #     happens here (VPU, free under the mem/MXU-bound step) instead of as a
    #     separate XLA pass over x in HBM. ---
    x_bf = x_ref[...].astype(jnp.bfloat16)
    logits = jnp.dot(x_bf, w_ref[...],
                     preferred_element_type=jnp.float32) + b_ref[...]
    pos_ref[...] = logits.astype(pos_ref.dtype)

    # --- masked cross-entropy partials.  lab already encodes ignore_index:
    #     wrapper set lab = where(mask==1, labels, -100). ---
    lab = lab_ref[...]                                            # (TM, 1) int32
    row = (jax.lax.broadcasted_iota(jnp.int32, lab.shape, 0)
           + pl.program_id(0) * block_rows)                       # global row id
    # Rows past N (ragged last tile) hold unspecified data -> mask them out.
    valid = jnp.logical_and(lab != -100, row < n_rows)            # (TM, 1) bool

    col = jax.lax.broadcasted_iota(jnp.int32, logits.shape, 1)    # (TM, P)
    picked = jnp.sum(jnp.where(col == lab, logits, 0.0),
                     axis=-1, keepdims=True)                      # (TM, 1)

    mx = jnp.max(logits, axis=-1, keepdims=True)
    lse = jnp.log(jnp.sum(jnp.exp(logits - mx), axis=-1, keepdims=True)) + mx

    # jnp.where (select) so NaN/Inf from garbage padded rows never propagate.
    per_row = jnp.where(valid, lse - picked, 0.0)                 # (TM, 1)

    loss_sum = jnp.sum(per_row)
    # NOTE: f32 count is exact up to ~2^24 valid tokens; fine for B*S here.
    loss_cnt = jnp.sum(valid.astype(jnp.float32))

    # Pack both partials into one (1, 8, 128) block: sublane 0 = sum,
    # sublane 1 = count (single output DMA per step, no cross-step carry).
    sub = jax.lax.broadcasted_iota(jnp.int32, part_ref.shape, 1)
    part_ref[...] = jnp.where(sub == 0, loss_sum,
                              jnp.where(sub == 1, loss_cnt, 0.0)).astype(
                                  part_ref.dtype)


def entity_recognition_forward(hidden, weight_t, bias, labels, attention_mask,
                               *, tile_rows=2048):
    """hidden: (B, S, 768) f32, weight_t: (768, P) (= PyTorch Linear weight.T),
       bias: (P,), labels / attention_mask: (B, S) int.
       Returns (POS: (B, S, P) f32, lossPos: scalar f32)."""
    B, S, H = hidden.shape
    P = weight_t.shape[1]
    N = B * S

    # Tile choice: default 2048 rows, but (a) never (much) larger than the
    # input and (b) aim for >= 4 blocks so the "parallel" grid axis still
    # load-balances across v7x's two TensorCores.
    tm = min(tile_rows, max(8, _round_up(-(-N // 4), 8)))
    n_blocks = pl.cdiv(N, tm)

    x = hidden.reshape(N, H)                       # f32; bf16 cast is in-kernel
    # Merge mask into labels (tiny (N,) op, fuses in XLA); exact
    # CrossEntropyLoss(ignore_index=-100) semantics.
    lab = jnp.where(attention_mask.reshape(N) == 1,
                    labels.reshape(N).astype(jnp.int32),
                    jnp.int32(-100)).reshape(N, 1)
    w_bf = weight_t.astype(jnp.bfloat16)           # tiny (768, P) one-off cast
    b2d = bias.reshape(1, P).astype(jnp.float32)

    cost = pl.CostEstimate(
        flops=2 * N * H * P,
        transcendentals=N * (P + 1),
        bytes_accessed=(N * H * 4                  # x read (f32, single pass)
                        + H * P * 2                # W read (bf16)
                        + N * P * 4                # POS write
                        + N * 4                    # merged labels read
                        + n_blocks * 8 * 128 * 4), # packed partials write
    )

    kernel = functools.partial(_er_kernel, n_rows=N, block_rows=tm)

    pos, part = pl.pallas_call(
        kernel,
        out_shape=(
            jax.ShapeDtypeStruct((N, P), jnp.float32),              # POS
            jax.ShapeDtypeStruct((n_blocks, 8, 128), jnp.float32),  # packed partials
        ),
        grid_spec=pltpu.PrefetchScalarGridSpec(
            num_scalar_prefetch=0,
            grid=(n_blocks,),
            in_specs=[
                pl.BlockSpec((tm, H), lambda i: (i, 0)),   # x tile (f32)
                pl.BlockSpec((H, P), lambda i: (0, 0)),    # W (resident, bf16)
                pl.BlockSpec((1, P), lambda i: (0, 0)),    # bias (resident)
                pl.BlockSpec((tm, 1), lambda i: (i, 0)),   # merged labels
            ],
            out_specs=[
                pl.BlockSpec((tm, P), lambda i: (i, 0)),       # POS tile
                pl.BlockSpec((1, 8, 128), lambda i: (i, 0, 0)),# packed partials
            ],
        ),
        compiler_params=pltpu.CompilerParams(
            # No cross-step carry -> fully parallel grid (both TCs on v7x).
            dimension_semantics=("parallel",),
            # 2048-row f32 x tiles need ~20 MiB double-buffered; v5e's default
            # scoped limit is 16 MiB.  48 MiB stays inside v7x's 64 MiB VMEM.
            vmem_limit_bytes=48 << 20),
        cost_estimate=cost,
    )(x, w_bf, b2d, lab)

    loss_sum = jnp.sum(part[:, 0, 0])
    loss_cnt = jnp.sum(part[:, 1, 0])
    # NOTE: NaN when there are zero valid tokens — matches PyTorch CE behavior.
    loss = loss_sum / loss_cnt
    return pos.reshape(B, S, P), loss


def _reference(hidden, weight_t, bias, labels, attention_mask):
    """Pure-JAX reference with the same bf16-matmul / f32-accumulate numerics."""
    B, S, H = hidden.shape
    P = weight_t.shape[1]
    x = hidden.reshape(-1, H).astype(jnp.bfloat16)
    logits = jnp.dot(x, weight_t.astype(jnp.bfloat16),
                     preferred_element_type=jnp.float32) + bias[None, :]
    lab = labels.reshape(-1)
    valid = (attention_mask.reshape(-1) == 1) & (lab != -100)
    lse = jax.nn.logsumexp(logits, axis=-1)
    picked = jnp.take_along_axis(logits, jnp.where(lab < 0, 0, lab)[:, None],
                                 axis=-1)[:, 0]
    per = jnp.where(valid, lse - picked, 0.0)
    loss = per.sum() / valid.sum()
    return logits.reshape(B, S, P), loss


if __name__ == "__main__":
    B, S, H = 2, 8, 768          # hidden=768 is fixed by nn.Linear(768, postotal)
    POSTOTAL = 9

    key = jax.random.PRNGKey(0)
    k_h, k_w, k_b, k_l, k_m = jax.random.split(key, 5)

    hidden = jax.random.normal(k_h, (B, S, H), dtype=jnp.float32)      # BERT output x
    weight_t = (jax.random.normal(k_w, (H, POSTOTAL), dtype=jnp.float32)
                * (1.0 / np.sqrt(H)))                                   # Linear W^T
    bias = jax.random.normal(k_b, (POSTOTAL,), dtype=jnp.float32) * 0.01
    labels = jax.random.randint(k_l, (B, S), 0, POSTOTAL, dtype=jnp.int32)   # tpos
    attention_mask = (jax.random.uniform(k_m, (B, S)) > 0.25).astype(jnp.int32)
    # guarantee >=1 valid token and exercise ignore_index=-100 at an attended pos
    attention_mask = attention_mask.at[0, 0].set(1)
    attention_mask = attention_mask.at[0, 1].set(1)
    labels = labels.at[0, 1].set(-100)

    fwd = jax.jit(functools.partial(entity_recognition_forward, tile_rows=2048))
    pos, loss_pos = fwd(hidden, weight_t, bias, labels, attention_mask)
    jax.block_until_ready((pos, loss_pos))

    pos_ref, loss_ref = _reference(hidden, weight_t, bias, labels, attention_mask)
    np.testing.assert_allclose(np.asarray(pos), np.asarray(pos_ref),
                               rtol=2e-3, atol=2e-3)
    np.testing.assert_allclose(float(loss_pos), float(loss_ref),
                               rtol=2e-3, atol=2e-3)

    print("KERNEL_OK")
</pallas_src>

<mosaic_0001>
module attributes {stable_mosaic.version = 11 : i64} {
  func.func @_er_kernel(%arg0: i32, %arg1: memref<8x768xf32, #tpu.memory_space<vmem>>, %arg2: memref<768x9xbf16, #tpu.memory_space<vmem>>, %arg3: memref<1x9xf32, #tpu.memory_space<vmem>>, %arg4: memref<8x1xi32, #tpu.memory_space<vmem>>, %arg5: memref<8x9xf32, #tpu.memory_space<vmem>>, %arg6: memref<1x8x128xf32, #tpu.memory_space<vmem>>) attributes {dimension_semantics = [#tpu.dimension_semantics<parallel>], iteration_bounds = array<i64: 2>, scalar_prefetch = 0 : i64, scratch_operands = 0 : i64, tpu.core_type = #tpu.core_type<tc>, window_params = [{transform_indices = @transform_0, window_bounds = array<i64: 8, 768>}, {pipeline_mode = #tpu.pipeline_mode<synchronous>, transform_indices = @transform_1, window_bounds = array<i64: 768, 9>}, {pipeline_mode = #tpu.pipeline_mode<synchronous>, transform_indices = @transform_2, window_bounds = array<i64: 1, 9>}, {transform_indices = @transform_3, window_bounds = array<i64: 8, 1>}, {transform_indices = @transform_4, window_bounds = array<i64: 8, 9>}, {transform_indices = @transform_5, window_bounds = array<i64: 1, 8, 128>}]} {
    %c0 = arith.constant 0 : index
    %c0_0 = arith.constant 0 : index
    %0 = vector.load %arg1[%c0, %c0_0] : memref<8x768xf32, #tpu.memory_space<vmem>>, vector<8x768xf32>
    %1 = arith.truncf %0 : vector<8x768xf32> to vector<8x768xbf16>
    %c0_1 = arith.constant 0 : index
    %c0_2 = arith.constant 0 : index
    %2 = vector.load %arg2[%c0_1, %c0_2] : memref<768x9xbf16, #tpu.memory_space<vmem>>, vector<768x9xbf16>
    %cst = arith.constant dense<0.000000e+00> : vector<8x9xf32>
    %3 = tpu.matmul %1, %2, %cst {dimension_numbers = #tpu.dot_dimension_numbers<[1], [0], [0], [1], [0, 0, 1, 1], [], []>} : vector<8x768xbf16>, vector<768x9xbf16>, vector<8x9xf32> -> vector<8x9xf32>
    %c0_3 = arith.constant 0 : index
    %c0_4 = arith.constant 0 : index
    %4 = vector.load %arg3[%c0_3, %c0_4] : memref<1x9xf32, #tpu.memory_space<vmem>>, vector<1x9xf32>
    %5 = vector.broadcast %4 : vector<1x9xf32> to vector<8x9xf32>
    %6 = arith.addf %3, %5 : vector<8x9xf32>
    %c0_5 = arith.constant 0 : index
    %c0_6 = arith.constant 0 : index
    %7 = vector.load %arg5[%c0_5, %c0_6] : memref<8x9xf32, #tpu.memory_space<vmem>>, vector<8x9xf32>
    tpu.vector_store %arg5[%c0_5, %c0_6], %6 {strides = array<i32>} : memref<8x9xf32, #tpu.memory_space<vmem>>, vector<8x9xf32>,
    %c0_7 = arith.constant 0 : index
    %c0_8 = arith.constant 0 : index
    %8 = vector.load %arg4[%c0_7, %c0_8] : memref<8x1xi32, #tpu.memory_space<vmem>>, vector<8x1xi32>
    %9 = tpu.iota {dimensions = array<i32: 0>} : vector<8x1xi32>
    %c8_i32 = arith.constant 8 : i32
    %10 = arith.muli %arg0, %c8_i32 : i32
    %11 = vector.broadcast %10 : i32 to vector<8x1xi32>
    %12 = arith.addi %9, %11 : vector<8x1xi32>
    %c-100_i32 = arith.constant -100 : i32
    %13 = vector.broadcast %c-100_i32 : i32 to vector<8x1xi32>
    %14 = arith.cmpi ne, %8, %13 : vector<8x1xi32>
    %c16_i32 = arith.constant 16 : i32
    %15 = vector.broadcast %c16_i32 : i32 to vector<8x1xi32>
    %16 = arith.cmpi slt, %12, %15 : vector<8x1xi32>
    %17 = arith.andi %14, %16 : vector<8x1xi1>
    %18 = tpu.iota {dimensions = array<i32: 1>} : vector<8x9xi32>
    %19 = vector.broadcast %8 : vector<8x1xi32> to vector<8x9xi32>
    %20 = arith.cmpi eq, %18, %19 : vector<8x9xi32>
    %cst_9 = arith.constant 0.000000e+00 : f32
    %21 = vector.broadcast %cst_9 : f32 to vector<8x9xf32>
    %22 = arith.select %20, %6, %21 : vector<8x9xi1>, vector<8x9xf32>
    %cst_10 = arith.constant dense<0.000000e+00> : vector<8xf32>
    %23 = vector.multi_reduction <add>, %22, %cst_10 [1] : vector<8x9xf32> to vector<8xf32>
    %24 = vector.shape_cast %23 : vector<8xf32> to vector<8x1xf32>
    %cst_11 = arith.constant dense<0xFF800000> : vector<8xf32>
    %25 = vector.multi_reduction <maximumf>, %6, %cst_11 [1] : vector<8x9xf32> to vector<8xf32>
    %26 = vector.shape_cast %25 : vector<8xf32> to vector<8x1xf32>
    %27 = vector.broadcast %26 : vector<8x1xf32> to vector<8x9xf32>
    %28 = arith.subf %6, %27 : vector<8x9xf32>
    %29 = math.exp %28 : vector<8x9xf32>
    %cst_12 = arith.constant dense<0.000000e+00> : vector<8xf32>
    %30 = vector.multi_reduction <add>, %29, %cst_12 [1] : vector<8x9xf32> to vector<8xf32>
    %31 = vector.shape_cast %30 : vector<8xf32> to vector<8x1xf32>
    %32 = math.log %31 : vector<8x1xf32>
    %33 = arith.addf %32, %26 : vector<8x1xf32>
    %34 = arith.subf %33, %24 : vector<8x1xf32>
    %cst_13 = arith.constant 0.000000e+00 : f32
    %35 = vector.broadcast %cst_13 : f32 to vector<8x1xf32>
    %36 = arith.select %17, %34, %35 : vector<8x1xi1>, vector<8x1xf32>
    %37 = vector.shape_cast %36 : vector<8x1xf32> to vector<1x8x1xf32>
    %cst_14 = arith.constant dense<0.000000e+00> : vector<1xf32>
    %38 = vector.multi_reduction <add>, %37, %cst_14 [1, 2] : vector<1x8x1xf32> to vector<1xf32>
    %39 = vector.shape_cast %38 : vector<1xf32> to vector<1x1x1xf32>
    %40 = vector.extract %39[0, 0, 0] : f32 from vector<1x1x1xf32>
    %41 = arith.extui %17 : vector<8x1xi1> to vector<8x1xi32>
    %42 = arith.sitofp %41 : vector<8x1xi32> to vector<8x1xf32>
    %43 = vector.shape_cast %42 : vector<8x1xf32> to vector<1x8x1xf32>
    %cst_15 = arith.constant dense<0.000000e+00> : vector<1xf32>
    %44 = vector.multi_reduction <add>, %43, %cst_15 [1, 2] : vector<1x8x1xf32> to vector<1xf32>
    %45 = vector.shape_cast %44 : vector<1xf32> to vector<1x1x1xf32>
    %46 = vector.extract %45[0, 0, 0] : f32 from vector<1x1x1xf32>
    %47 = tpu.iota {dimensions = array<i32: 1>} : vector<1x8x128xi32>
    %c0_i32 = arith.constant 0 : i32
    %48 = vector.broadcast %c0_i32 : i32 to vector<1x8x128xi32>
    %49 = arith.cmpi eq, %47, %48 : vector<1x8x128xi32>
    %c1_i32 = arith.constant 1 : i32
    %50 = vector.broadcast %c1_i32 : i32 to vector<1x8x128xi32>
    %51 = arith.cmpi eq, %47, %50 : vector<1x8x128xi32>
    %cst_16 = arith.constant 0.000000e+00 : f32
    %52 = vector.broadcast %46 : f32 to vector<1x8x128xf32>
    %53 = vector.broadcast %cst_16 : f32 to vector<1x8x128xf32>
    %54 = arith.select %51, %52, %53 : vector<1x8x128xi1>, vector<1x8x128xf32>
    %55 = vector.broadcast %40 : f32 to vector<1x8x128xf32>
    %56 = arith.select %49, %55, %54 : vector<1x8x128xi1>, vector<1x8x128xf32>
    %c0_17 = arith.constant 0 : index
    %c0_18 = arith.constant 0 : index
    %c0_19 = arith.constant 0 : index
    %57 = vector.load %arg6[%c0_17, %c0_18, %c0_19] : memref<1x8x128xf32, #tpu.memory_space<vmem>>, vector<1x8x128xf32>
    tpu.vector_store %arg6[%c0_17, %c0_18, %c0_19], %56 {strides = array<i32>} : memref<1x8x128xf32, #tpu.memory_space<vmem>>, vector<1x8x128xf32>,
    return
  }
  func.func @transform_0(%arg0: i32) -> (i32, i32) {
    %c0_i32 = arith.constant 0 : i32
    %c0_i32_0 = arith.constant 0 : i32
    return %arg0, %c0_i32 : i32, i32
  }
  func.func @transform_1(%arg0: i32) -> (i32, i32) {
    %c0_i32 = arith.constant 0 : i32
    %c0_i32_0 = arith.constant 0 : i32
    %c0_i32_1 = arith.constant 0 : i32
    return %c0_i32, %c0_i32_0 : i32, i32
  }
  func.func @transform_2(%arg0: i32) -> (i32, i32) {
    %c0_i32 = arith.constant 0 : i32
    %c0_i32_0 = arith.constant 0 : i32
    %c0_i32_1 = arith.constant 0 : i32
    return %c0_i32, %c0_i32_0 : i32, i32
  }
  func.func @transform_3(%arg0: i32) -> (i32, i32) {
    %c0_i32 = arith.constant 0 : i32
    %c0_i32_0 = arith.constant 0 : i32
    return %arg0, %c0_i32 : i32, i32
  }
  func.func @transform_4(%arg0: i32) -> (i32, i32) {
    %c0_i32 = arith.constant 0 : i32
    %c0_i32_0 = arith.constant 0 : i32
    return %arg0, %c0_i32 : i32, i32
  }
  func.func @transform_5(%arg0: i32) -> (i32, i32, i32) {
    %c0_i32 = arith.constant 0 : i32
    %c0_i32_0 = arith.constant 0 : i32
    %c0_i32_1 = arith.constant 0 : i32
    return %arg0, %c0_i32, %c0_i32_0 : i32, i32, i32
  }
}

</mosaic_0001>

<bundles_post_ra>
// kernel: entity_recognition_forward.1
= control target key start
LH: loop header
LB: loop body
LE: loop exit
PB: predicated region body
PF: predicated region fallthrough
CT: control target
= control target key end

     0   :  { %11 = vsyncpa [#allocation3], 0  ;;  %s1565_s0 = inlined_call_operand.vmem [shape: f32[16,768], index: 0, kind: input, shape index: {}]   ;;  %s1566_s1 = inlined_call_operand.vmem [shape: bf16[768,9], index: 1, kind: input, shape index: {}]   ;;  %s1567_s2 = inlined_call_operand.vmem [shape: f32[1,9], index: 2, kind: input, shape index: {}]   ;;  %s1568_s3 = inlined_call_operand.vmem [shape: s32[16,1], index: 3, kind: input, shape index: {}]   ;;  %s1569_s4 = inlined_call_operand.hbm [shape: f32[16,9], index: 4, kind: output, shape index: {0}]   ;;  %s1570_s5 = inlined_call_operand.vmem [shape: f32[2,8,128], index: 5, kind: output, shape index: {1}]  }
   0x1   :  { %13 = vsyncpa [#allocation3 + $0x1], 0  ;;  %s1281_s18 = smov 0   ;;  %s1283_s19 = smov 0  }
   0x2   :  { %s1285_s20 = smov 0   ;;  %s1287_s21 = smov 0  }
   0x3 LB: > { %s1302_s22 = sadd.s32 4294967295, %s1246_s21   ;;  %s956_s23 = sadd.s32 4294967294, %s1246_s21   ;;  %s1246_s21 = sphi %s1287_s21, %s1576_s21   ;;  %s1242_s20 = sphi %s1285_s20, %s1575_s20   ;;  %s1238_s19 = sphi %s1283_s19, %s1574_s19   ;;  %s1234_s18 = sphi %s1281_s18, %s1573_s18  }
   0x4   : > { %s1306_s24 = sadd.s32 1, %s1246_s21   ;;  %s120_s25 = sadd.s32 1, %s1242_s20 }
   0x5   : > { %s117_s26 = ssub.s32 %s1246_s21, %s1306_s24  ;;  %p130_p0 = scmp.ne.s32.totalorder %s1242_s20, %s1238_s19 }
   0x6   : > { %p118_p1 = scmp.eq.s32.totalorder %s117_s26, 0  ;;  %p131_p2 = scmp.eq.s32.totalorder %s1302_s22, 1 }
   0x7   : > { %p136_p3 = scmp.ne.s32.totalorder %s1238_s19, %s1234_s18  ;;  %p137_p4 = scmp.eq.s32.totalorder %s956_s23, 1 }
   0x8   : > { %s1317_s27 = scalar_select %p118_p1, %s1242_s20, %s120_s25  }
   0x9   : > { %p1319_p5 = por %p131_p2, %p130_p0  ;;  %p1323_p6 = por %p137_p4, %p136_p3 }
   0xa   : > { %p959_p7 = scmp.ge.s32.totalorder %s1246_s21, 1  ;;  %p202_p8 = scmp.lt.s32.totalorder %s1246_s21, 3 }
   0xc   : > { %p203_p9 = pnand %p959_p7, %p202_p8 }
   0xd   : > { %v1132_v0 = vld [vmem:[%s1566_s1 + $0x40] sm:$0xff] (!%p203_p9)   ;;  %v1136_v4 = vld [vmem:[%s1566_s1 + $0x48] sm:$0xff] (!%p203_p9)   ;;  %v1140_v8 = vld [vmem:[%s1566_s1 + $0x50] sm:$0xff] (!%p203_p9)   ;;  %p238_p10 = scmp.lt.s32.totalorder (!%p203_p9), %s1302_s22, 1  ;;  %v1248_v60 = vmov (!%p203_p9), 0   ;;  %vm775_vm0 = vcmask (!%p203_p9), 72704  }
   0xe   : > { %206 = sbr.rel (%p203_p9) target bundleno = 827 (0x33b), region = 36  ;;  %v1133_v1 = vld [vmem:[%s1566_s1] sm:$0xff] (!%p203_p9)   ;;  %1019 = vmatprep.subr.bf16.mxu0 (!%p203_p9), %v1132_v0  ;;  %v1137_v5 = vld [vmem:[%s1566_s1 + $0x8] sm:$0xff] (!%p203_p9)   ;;  %v1141_v9 = vld [vmem:[%s1566_s1 + $0x10] sm:$0xff] (!%p203_p9)   ;;  %1131 = vset.pattern.permute.xlu0 (!%p203_p9), %v1248_v60  ;;  %vm810_vm5 = vcmask (!%p203_p9), 7168   ;;  %s1016_s10 = sshll.u32 (!%p203_p9), %s1302_s22, 7 }
   0xf   : > { %v1134_v2 = vld [vmem:[%s1566_s1 + $0xc0] sm:$0xff] (!%p203_p9)   ;;  %1020 = vmatpush3.bf16.msra.mxu0 (!%p203_p9), %v1133_v1  ;;  %v1138_v6 = vld [vmem:[%s1566_s1 + $0xc8] sm:$0xff] (!%p203_p9)   ;;  %v1142_v10 = vld [vmem:[%s1566_s1 + $0xd0] sm:$0xff] (!%p203_p9)   ;;  %s1520_s14 = scalar_lea.hbm (!%p203_p9), %s1569_s4, %s1016_s10  ;;  %s1250_s6 = smov (!%p203_p9), [#allocation2]  }
  0x10   : > { %v1135_v3 = vld [vmem:[%s1566_s1 + $0x80] sm:$0xff] (!%p203_p9)   ;;  %1041 = vmatprep.subr.bf16.mxu1 (!%p203_p9), %v1134_v2  ;;  %1021 = vmatprep.subr.bf16.mxu0 (!%p203_p9), %v1136_v4  ;;  %v1139_v7 = vld [vmem:[%s1566_s1 + $0x88] sm:$0xff] (!%p203_p9)   ;;  %v1143_v11 = vld [vmem:[%s1566_s1 + $0x90] sm:$0xff] (!%p203_p9)   ;;  %s1188_s7 = sshll.u32 (!%p203_p9), %s1250_s6, 4  ;;  %s1189_s7 = int_to_ptr.vmem [resolvable:$false] %s1188_s7 }
  0x11   : > { %1042 = vmatpush3.bf16.msra.mxu1 (!%p203_p9), %v1135_v3  ;;  %v1144_v12 = vld [vmem:[%s1566_s1 + $0x58] sm:$0xff] (!%p203_p9)   ;;  %v1148_v16 = vld [vmem:[%s1566_s1 + $0x60] sm:$0xff] (!%p203_p9)   ;;  %v1152_v20 = vld [vmem:[%s1566_s1 + $0x68] sm:$0xff] (!%p203_p9)  }
  0x12   : > { %1043 = vmatprep.subr.bf16.mxu1 (!%p203_p9), %v1138_v6  ;;  %v1145_v13 = vld [vmem:[%s1566_s1 + $0x18] sm:$0xff] (!%p203_p9)   ;;  %v1149_v17 = vld [vmem:[%s1566_s1 + $0x20] sm:$0xff] (!%p203_p9)   ;;  %v1153_v21 = vld [vmem:[%s1566_s1 + $0x28] sm:$0xff] (!%p203_p9)  }
  0x13   : > { %1022 = vmatpush3.bf16.msra.mxu0 (!%p203_p9), %v1137_v5  ;;  %v1146_v14 = vld [vmem:[%s1566_s1 + $0xd8] sm:$0xff] (!%p203_p9)   ;;  %v1150_v18 = vld [vmem:[%s1566_s1 + $0xe0] sm:$0xff] (!%p203_p9)   ;;  %v1154_v22 = vld [vmem:[%s1566_s1 + $0xe8] sm:$0xff] (!%p203_p9)  }
  0x14   : > { %1023 = vmatprep.subr.bf16.mxu0 (!%p203_p9), %v1140_v8  ;;  %v1147_v15 = vld [vmem:[%s1566_s1 + $0x98] sm:$0xff] (!%p203_p9)   ;;  %v1151_v19 = vld [vmem:[%s1566_s1 + $0xa0] sm:$0xff] (!%p203_p9)   ;;  %v1155_v23 = vld [vmem:[%s1566_s1 + $0xa8] sm:$0xff] (!%p203_p9)  }
  0x15   : > { %1044 = vmatpush3.bf16.msra.mxu1 %v1139_v7  ;;  %s1394_s15 = scalar_select %p238_p10, %s1302_s22, 1  ;;  %v1156_v24 = vld [vmem:[%s1566_s1 + $0x70] sm:$0xff]   ;;  %v1160_v28 = vld [vmem:[%s1566_s1 + $0x78] sm:$0xff]   ;;  %v1164_v36 = vld [vmem:[%s1566_s1 + $0x140] sm:$0xff]  }
  0x16   : > { %1045 = vmatprep.subr.bf16.mxu1 %v1142_v10  ;;  %v1157_v25 = vld [vmem:[%s1566_s1 + $0x30] sm:$0xff]   ;;  %v1161_v29 = vld [vmem:[%s1566_s1 + $0x38] sm:$0xff]   ;;  %v1165_v39 = vld [vmem:[%s1566_s1 + $0x100] sm:$0xff]  }
  0x17   : > { %1024 = vmatpush3.bf16.msra.mxu0 %v1141_v9  ;;  %s1085_s8 = smul.u32 48, %s1394_s15  ;;  %v1158_v26 = vld [vmem:[%s1566_s1 + $0xf0] sm:$0xff]   ;;  %v1162_v30 = vld [vmem:[%s1566_s1 + $0xf8] sm:$0xff]   ;;  %v1166_v42 = vld [vmem:[%s1566_s1 + $0x148] sm:$0xff]   ;;  %s962_s30 = sshll.u32 %s1394_s15, 3 }
  0x18   : > { %1025 = vmatprep.subr.bf16.mxu0 %v1144_v12  ;;  %v1159_v27 = vld [vmem:[%s1566_s1 + $0xb0] sm:$0xff]   ;;  %v1163_v33 = vld [vmem:[%s1566_s1 + $0xb8] sm:$0xff]   ;;  %v1167_v43 = vld [vmem:[%s1566_s1 + $0x108] sm:$0xff]   ;;  %s246_s9 = scalar_lea.vmem %s1568_s3, %s962_s30 }
  0x19   : > { %1046 = vmatpush3.bf16.msra.mxu1 %v1143_v11  ;;  %s1424_s26 = scalar_lea.vmem %s1565_s0, %s1085_s8  ;;  %v1168_v44 = vld [vmem:[%s1566_s1 + $0x150] sm:$0xff]   ;;  %v1170_v46 = vld [vmem:[%s1566_s1 + $0x158] sm:$0xff]   ;;  %v1172_v48 = vld [vmem:[%s1566_s1 + $0x160] sm:$0xff]   ;;  %s1013_s8 = sshll.u32 %s1302_s22, 3 }
  0x1a   : > { %1047 = vmatprep.subr.bf16.mxu1 %v1146_v14  ;;  %v253_v31 = vld [vmem:[%s1424_s26 + $0x8] sm:$0xff]  ;;  %v252_v34 = vld [vmem:[%s1424_s26] sm:$0xff]  ;;  %v255_v37 = vld [vmem:[%s1424_s26 + $0x18] sm:$0xff] }
  0x1b   : > { %1026 = vmatpush3.bf16.msra.mxu0 %v1145_v13  ;;  %v259_v32 = vpack.c.bf16 %v253_v31, %v253_v31  ;;  %v258_v35 = vpack.c.bf16 %v252_v34, %v252_v34  ;;  %v261_v38 = vpack.c.bf16 %v255_v37, %v255_v37  ;;  %v254_v40 = vld [vmem:[%s1424_s26 + $0x10] sm:$0xff]  ;;  %v1171_v47 = vld [vmem:[%s1566_s1 + $0x118] sm:$0xff]   ;;  %v1173_v49 = vld [vmem:[%s1566_s1 + $0x120] sm:$0xff]  }
  0x1c   : > { %1027 = vmatprep.subr.bf16.mxu0 %v1148_v16  ;;  %v260_v41 = vpack.c.bf16 %v254_v40, %v254_v40  ;;  %v1169_v45 = vld [vmem:[%s1566_s1 + $0x110] sm:$0xff]   ;;  %v1174_v50 = vld [vmem:[%s1566_s1 + $0x168] sm:$0xff]   ;;  %v1178_v56 = vld [vmem:[%s1566_s1 + $0x178] sm:$0xff]  }
  0x1d   : > { %1048 = vmatpush3.bf16.msra.mxu1 %v1147_v15  ;;  %687 = vmatprep.mubr.bf16.mxu0 %v259_v32  ;;  %v257_v51 = vld [vmem:[%s1424_s26 + $0x28] sm:$0xff]  ;;  %v1176_v54 = vld [vmem:[%s1566_s1 + $0x170] sm:$0xff]   ;;  %v1179_v57 = vld [vmem:[%s1566_s1 + $0x138] sm:$0xff]  }
  0x1e   : > { %1049 = vmatprep.subr.bf16.mxu1 %v1150_v18  ;;  %727 = vmatprep.mubr.bf16.mxu1 %v261_v38  ;;  %v263_v52 = vpack.c.bf16 %v257_v51, %v257_v51  ;;  %v1175_v53 = vld [vmem:[%s1566_s1 + $0x128] sm:$0xff]   ;;  %v1177_v55 = vld [vmem:[%s1566_s1 + $0x130] sm:$0xff]   ;;  %v256_v58 = vld [vmem:[%s1424_s26 + $0x20] sm:$0xff]  ;;  %s229_s26 = sand.u32 1, %s1238_s19   ;;  %v1249_v38 = vmov 0.0  }
  0x1f   : > { %1028 = vmatpush3.bf16.msra.mxu0 %v1149_v17  ;;  %v262_v59 = vpack.c.bf16 %v256_v58, %v256_v58  ;;  %v964_v62 = vld [vmem:[%s1567_s2] ss:$0 sm:$0xff]  ;;  %s1495_s23 = sshll.u32 %s229_s26, 3  ;;  %s841_s16 = scalar_lea.sflag [#allocation3], %s229_s26 }
  0x20   : > { %1029 = vmatprep.subr.bf16.mxu0 %v1152_v20  ;;  %s231_s25 = scalar_lea.vmem [#allocation2], %s1495_s23  ;;  %v777_v17 = vld [vmem:[%s246_s9] sm:$0xff]  ;;  %s1190_s9 = scalar_lea.vmem %s1189_s7, 256 }
  0x21   : > { %1050 = vmatpush3.bf16.msra.mxu1 %v1151_v19  ;;  %vm783_vm2 = vcmp.ne.s32.totalorder %v777_v17, 4294967196  ;;  %s858_s11 = sshll.u32 %s231_s25, 4  ;;  %s859_s11 = int_to_ptr.vmem [resolvable:$true] %s858_s11 }
  0x22   : > { %1051 = vmatprep.subr.bf16.mxu1 %v1154_v22  ;;  %s1184_s17 = scalar_lea.vmem %s859_s11, 128  ;;  %p1191_p0 = scmp.lt.s32.totalorder %s859_s11, %s1189_s7 }
  0x23   : > { %1030 = vmatpush3.bf16.msra.mxu0 %v1153_v21  ;;  %v778_v21 = vlaneseq  ;;  %p1185_p11 = scmp.ne.s32.totalorder %s859_s11, %s1184_s17  ;;  %p1192_p1 = scmp.lt.s32.totalorder %s1190_s9, %s1184_s17 }
  0x24   : > { %1031 = vmatprep.subr.bf16.mxu0 %v1156_v24 }
  0x25   : > { %1052 = vmatpush3.bf16.msra.mxu1 %v1155_v23  ;;  %v787_v22 = vand.u32 127, %v778_v21  ;;  %p1186_p12 = pnand %p1185_p11, %p1319_p5  ;;  %p1193_p2 = por %p1192_p1, %p1191_p0 }
  0x26   : > { %1053 = vmatprep.subr.bf16.mxu1 %v1158_v26 }
  0x27   : > { %1032 = vmatpush3.bf16.msra.mxu0 %v1157_v25  ;;  %p1187_p13 = pneg %p1186_p12 }
  0x28   : > { %1033 = vmatprep.subr.bf16.mxu0 %v1160_v28 }
  0x29   : > { %1054 = vmatpush3.bf16.msra.mxu1 %v1159_v27  ;;  %p1194_p3 = pnand %p1193_p2, %p1187_p13 }
  0x2a   : > { %1055 = vmatprep.subr.bf16.mxu1 %v1162_v30  ;;  %v781_v30 = vstv %s1013_s8 }
  0x2b   : > { %1034 = vmatpush3.bf16.msra.mxu0 %v1161_v29  ;;  %v1511_v29 = vshrl.u32 %v778_v21, 7 }
  0x2c   : > { %1063 = vmatprep.subr.bf16.mxu0 %v1164_v36 }
  0x2d   : > { %1056 = vmatpush3.bf16.msra.mxu1 %v1163_v33  ;;  %v782_v31 = vadd.s32 %v781_v30, %v1511_v29 }
  0x2e   : > { %688 = vmatmul.mubr.bf16.vlgmr.msra.gmra.mrb[0].mxu0 %v258_v35 }
  0x2f   : > { %1064 = vmatpush3.bf16.msra.mxu0 %v1165_v39  ;;  %767 = vmatprep.mubr.bf16.mxu0 %v263_v52  ;;  %vm784_vm3 = vcmp.lt.s32.totalorder %v782_v31, 16 }
  0x30   : > { %728 = vmatmul.mubr.bf16.vlgmr.msra.gmra.mrb[0].mxu1 %v260_v41  ;;  %1065 = vmatprep.subr.bf16.mxu0 %v1166_v42  ;;  %vm785_vm4 = vmand %vm783_vm2, %vm784_vm3 }
  0x31   : > { %v1014_v39 = vsel %vm785_vm4, 1.0, %v1249_v38 }
  0x32   : > { %v823_v41 = vsel %vm810_vm5, %v1014_v39, 0.0 }
  0x33   : > { %1066 = vmatpush3.bf16.msra.mxu0 %v1167_v43 }
  0x34   : > { %1067 = vmatprep.subr.bf16.mxu0 %v1168_v44 }
  0x37   : > { %1068 = vmatpush3.bf16.msra.mxu0 %v1169_v45 }
  0x38   : > { %1069 = vmatprep.subr.bf16.mxu0 %v1170_v46 }
  0x3b   : > { %1070 = vmatpush3.bf16.msra.mxu0 %v1171_v47 }
  0x3c   : > { %1071 = vmatprep.subr.bf16.mxu0 %v1172_v48 }
  0x3f   : > { %1072 = vmatpush3.bf16.msra.mxu0 %v1173_v49 }
  0x40   : > { %1073 = vmatprep.subr.bf16.mxu0 %v1174_v50 }
  0x43   : > { %1074 = vmatpush3.bf16.msra.mxu0 %v1175_v53 }
  0x44   : > { %1075 = vmatprep.subr.bf16.mxu0 %v1176_v54 }
  0x47   : > { %1076 = vmatpush3.bf16.msra.mxu0 %v1177_v55 }
  0x48   : > { %1077 = vmatprep.subr.bf16.mxu0 %v1178_v56 }
  0x4b   : > { %1078 = vmatpush3.bf16.msra.mxu0 %v1179_v57 }
  0x4e   : > { %768 = vmatmul.mubr.bf16.vlgmr.msra.gmra.mrb[4].mxu0 %v262_v59 }
 0x101   : > { %v1035_v61 = vpop.f32.mrb[0].mxu0 }
 0x102   : > { %v1036_v63 = vpop.f32.mrb[1].mxu0 }
 0x103   : > { %v1037_v0 = vadd.f32 %v1036_v63, %v1035_v61  ;;  %v1038_v1 = vpop.f32.mrb[2].mxu0  ;;  %v1057_v2 = vpop.f32.mrb[0].mxu1 }
 0x104   : > { %v1039_v3 = vpop.f32.mrb[3].mxu0  ;;  %v1058_v5 = vpop.f32.mrb[1].mxu1 }
 0x105   : > { %v690_v4 = vadd.f32 %v1037_v0, %v964_v62  ;;  %v1059_v6 = vadd.f32 %v1058_v5, %v1057_v2  ;;  %v1060_v7 = vpop.f32.mrb[2].mxu1 }
 0x106   : > { %v1061_v8 = vpop.f32.mrb[3].mxu1 }
 0x107   : > { %v730_v9 = vadd.f32 %v1059_v6, %v690_v4 }
 0x121   : > { %v1079_v10 = vpop.f32.mrb[4].mxu0 }
 0x122   : > { %v1080_v11 = vpop.f32.mrb[5].mxu0 }
 0x123   : > { %v1081_v12 = vadd.f32 %v1080_v11, %v1079_v10  ;;  %v1082_v13 = vpop.f32.mrb[6].mxu0 }
 0x124   : > { %v1083_v14 = vpop.f32.mrb[7].mxu0 }
 0x125   : > { %v770_v15 = vadd.f32 %v1081_v12, %v730_v9 }
 0x127   : > { %v796_v16 = vsel %vm775_vm0, %v770_v15, -inf  ;;  %776 = vst.msk [vmem:[%s231_s25] sm:$0xff] %vm775_vm0, %v770_v15 }
 0x128   : > { %797 = vmax.xlane.f32.xlu0 %v796_v16 }
 0x13e   : > { %789 = vperm.xlu0 %1131, %v777_v17  }
 0x1b5   : > { %v798_v18 = vpop.xlane.xlu0 %797 }
 0x1b6   : > { %v799_v19 = vsub.f32 %v770_v15, %v798_v18 }
 0x1b8   : > { %v800_v20 = vmul.f32 1.442695, %v799_v19 }
 0x1ba   : > { %1180 = vpow2.f32 %v800_v20 }
 0x1bd   : > { %v790_v23 = vpop.permute.xlu0 %789 }
 0x1be   : > { %vm791_vm1 = vcmp.eq.s32.totalorder %v787_v22, %v790_v23 }
 0x1bf   : > { %v792_v26 = vsel %vm791_vm1, %v770_v15, 0.0 }
 0x1c0   : > { %v793_v27 = vsel %vm775_vm0, %v792_v26, 0.0 }
 0x1c4   : > { %v1181_v24 = vpop.eup %1180 }
 0x1c5   : > { %v802_v25 = vsel %vm775_vm0, %v1181_v24, 0.0 }
 0x1c6   : > { %803 = vadd.xlane.f32.xlu1 %v802_v25 }
 0x1ca   : > { %794 = vadd.xlane.f32.xlu1 %v793_v27 }
 0x253   : > { %v804_v28 = vpop.xlane.xlu1 %803 }
 0x254   : > { %1182 = vlog2.f32 %v804_v28 }
 0x257   : > { %v795_v35 = vpop.xlane.xlu1 %794 }
 0x25e   : > { %v1183_v32 = vpop.eup %1182 }
 0x25f   : > { %v806_v33 = vmul.f32 0.6931472, %v1183_v32 }
 0x261   : > { %v807_v34 = vadd.f32 %v806_v33, %v798_v18 }
 0x263   : > { %v808_v36 = vsub.f32 %v807_v34, %v795_v35 }
 0x265   : > { %v809_v37 = vsel %vm785_vm4, %v808_v36, 0.0 }
 0x266   : > { %v811_v40 = vsel %vm810_vm5, %v809_v37, 0.0 }
 0x267   : > { %812 = vadd.xlane.f32.xlu1 %v811_v40 }
 0x26b   : > { %824 = vadd.xlane.f32.xlu1 %v823_v41 }
 0x26c   : > { %1197 = shalt.err (!%p1194_p3)
}
 0x26d   : > { %s1198_s22 = scalar_lea.hbm %s1520_s14, 128  ;;  %s1202_s25 = scalar_lea.hbm %s1569_s4, 256 }
 0x26e   : > { %p1199_p4 = scmp.ne.s32.totalorder %s1520_s14, %s1198_s22  ;;  %p1203_p9 = scmp.lt.u32.totalorder %s1520_s14, %s1569_s4 }
 0x26f   : > { %p1204_p10 = scmp.lt.u32.totalorder %s1202_s25, %s1198_s22  ;;  %p1206_p12 = scmp.lt.u32.totalorder %s1198_s22, %s1520_s14 }
 0x270   : > { %p1200_p7 = pnand %p1199_p4, %p1319_p5 }
 0x271   : > { %p1205_p11 = por %p1204_p10, %p1203_p9 }
 0x272   : > { %p1201_p8 = pneg %p1200_p7 }
 0x273   : > { %p1207_p13 = por %p1206_p12, %p1205_p11 }
 0x275   : > { %p1208_p0 = pnand %p1207_p13, %p1201_p8 }
 0x277   : > { %1211 = shalt.err (!%p1208_p0)
}
 0x278   : > { %1090 = dma.vmem_to_hbm [thread:$0]  (%p1319_p5), %s859_s11, 128, %s1520_s14, %s841_s16   ;;  %vm834_vm6 = vcmp.eq.s32.totalorder %v1511_v29, 1  ;;  %vm833_vm7 = vcmp.eq.s32.totalorder %v1511_v29, 0 }
 0x279   : > { %s250_s14 = scalar_lea.vmem %s1570_s5, %s962_s30 }
 0x2f4   : > { %v813_v42 = vpop.xlane.xlu1 %812 }
 0x2f5   : > { %v814_v43 = vrot.slane %v813_v42, 4 }
 0x2f7   : > { %v815_v44 = vadd.f32 %v814_v43, %v813_v42 }
 0x2f8   : > { %v825_v45 = vpop.xlane.xlu1 %824 }
 0x2f9   : > { %v816_v46 = vrot.slane %v815_v44, 2  ;;  %v826_v47 = vrot.slane %v825_v45, 4 }
 0x2fb   : > { %v827_v48 = vadd.f32 %v826_v47, %v825_v45  ;;  %v817_v49 = vadd.f32 %v816_v46, %v815_v44 }
 0x2fd   : > { %v828_v50 = vrot.slane %v827_v48, 2  ;;  %v818_v51 = vrot.slane %v817_v49, 1 }
 0x2ff   : > { %v829_v52 = vadd.f32 %v828_v50, %v827_v48  ;;  %v819_v53 = vadd.f32 %v818_v51, %v817_v49 }
 0x301   : > { %1086 = vpush %v819_v53  ;;  %v830_v54 = vrot.slane %v829_v52, 1 }
 0x303   : > { %v831_v55 = vadd.f32 %v830_v54, %v829_v52 }
 0x305   : > { %1088 = vpush %v831_v55 }
 0x332   : > { %s1087_s28 = spop %1086 }
 0x333   : > { %v837_v57 = vstv %s1087_s28 }
 0x336   : > { %s1089_s11 = spop %1088 }
 0x337   : > { %v835_v56 = vstv %s1089_s11 }
 0x338   : > { %v836_v58 = vsel %vm834_vm6, %v835_v56, 0.0 }
 0x339   : > { %v838_v59 = vsel %vm833_vm7, %v837_v57, %v836_v58 }
 0x33a   : > { %839 = vst [vmem:[%s250_s14] sm:$0xff] %v838_v59 }
 0x33b PF: > { %p1096_p5 = scmp.ge.s32.totalorder %s1246_s21, 2  ;;  %s873_s16 = sand.u32 1, %s1234_s18  }
 0x33c   : > { %s874_s17 = scalar_lea.sflag [#allocation3], %s873_s16 }
 0x33d   : > { %p1093_p1 = pnand %p1096_p5, %p1323_p6 }
 0x33f   : > { %1229 = dma.done.wait (!%p1093_p1), %s874_s17, 128  }
 0x340   : > { %1231 = vsyncadd (!%p1093_p1), %s874_s17, 4294967168  ;;  %p16_p2 = scmp.ge.s32.totalorder %s1306_s24, 4   ;;  %s1573_s18 = smov %s1238_s19 }
 0x341   : > { %s1574_s19 = smov %s1242_s20  ;;  %s1575_s20 = smov %s1317_s27 }
 0x342   : > { %s1576_s21 = smov %s1306_s24  ;;  %18 = sbr.rel (!%p16_p2) target bundleno = 3 (0x3), region = 86 }
 0x349   :  { %886 = vsyncpa [#allocation3], 1 }
 0x34a   :  { %888 = vsyncpa [#allocation3 + $0x1], 1 }

</bundles_post_ra>
